<compile_context>
chip_gen: v5e
topology: v5e:2x2
jax: 0.10.0
libtpu: 0.0.40
codegen_flags: <defaults>
</compile_context>

<pallas_src>
import functools

import jax
import jax.numpy as jnp
from jax.experimental import pallas as pl
from jax.experimental.pallas import tpu as pltpu

HIDDEN = 64
LANE = 128           # padded lane width for hidden and action dims
MAX_TILE_B = 4096    # keeps double-buffered tiles well inside v5e's scoped VMEM


def _round_up(n, m):
    return ((n + m - 1) // m) * m


def _cdiv(a, b):
    return (a + b - 1) // b


def default_bf16_tanh():
    """bf16 tanh on v6e/v7x (bf16 EUP path); f32 tanh on v5e and older."""
    try:
        kind = jax.devices()[0].device_kind.lower()
    except Exception:  # pragma: no cover - be conservative if detection fails
        return False
    return not any(tag in kind for tag in ("v2", "v3", "v4", "v5"))


def policy_kernel(x_ref, w1_ref, b1_ref, w2_ref, b2_ref, w3_ref, b3_ref,
                  mean_ref, *, bf16_tanh):
    """One (tb, *) batch tile of the 3-layer tanh MLP.

    Layers 1/2: bf16 MXU operands, f32 accumulation, f32 bias add; tanh in
    bf16 (v6e/v7x) or f32 (v5e).  Layer 3: f32 weights and f32 matmul so no
    bf16 operand rounding lands directly on `mean`; the (optional) bf16 output
    store is the only final rounding.
    """
    x = x_ref[...].astype(jnp.bfloat16)                       # (tb, S)

    z1 = jnp.dot(x, w1_ref[...], preferred_element_type=jnp.float32) + b1_ref[...]
    if bf16_tanh:
        h1 = jnp.tanh(z1.astype(jnp.bfloat16))                # bf16 EUP, feeds MXU directly
    else:
        h1 = jnp.tanh(z1).astype(jnp.bfloat16)                # f32 EUP path (v5e)

    z2 = jnp.dot(h1, w2_ref[...], preferred_element_type=jnp.float32) + b2_ref[...]
    h2 = jnp.tanh(z2.astype(jnp.bfloat16)) if bf16_tanh else jnp.tanh(z2)

    mean = jnp.dot(h2.astype(jnp.float32), w3_ref[...],
                   preferred_element_type=jnp.float32) + b3_ref[...]
    mean_ref[...] = mean.astype(mean_ref.dtype)               # lane-dense store


def policy_forward(x, params, *, tile_b=MAX_TILE_B, out_dtype=jnp.bfloat16,
                   bf16_tanh=None, return_padded=False):
    """Returns (action_mean, sigma) -- the parameters of the Normal dist.

    If return_padded=True, action_mean is the raw (b_pad, 128) kernel output
    (valid data in [:B, :A]) so callers can index lanes lazily instead of
    paying for a separate padded-array slice pass.
    """
    B, S = x.shape
    A = int(params["sigma"].shape[0])
    HP = params["w1p"].shape[1]        # 128 (padded hidden)
    AP = params["w3p"].shape[1]        # 128 (padded action)

    if bf16_tanh is None:
        bf16_tanh = default_bf16_tanh()

    # --- load-balanced batch tiling ------------------------------------
    # Clamp the requested tile to [8, MAX_TILE_B] and a multiple of 8, then
    # derive the actual tile from B so padding waste stays below one sublane
    # group per grid step.  Keep >= 2 steps when B >= 16 so both v7x
    # TensorCores get work from the "parallel" grid axis.
    tile_b = _round_up(max(8, min(int(tile_b), MAX_TILE_B)), 8)
    n_steps = _cdiv(B, tile_b)
    if B >= 16:
        n_steps = max(n_steps, 2)
    tb = _round_up(_cdiv(B, n_steps), 8)
    b_pad = n_steps * tb
    if b_pad != B:
        x = jnp.pad(x, ((0, b_pad - B), (0, 0)))

    const = lambda i: (0, 0)           # weights/biases: same block every step

    out_bytes = jnp.dtype(out_dtype).itemsize
    cost = pl.CostEstimate(
        flops=2 * b_pad * (S * HP + HP * HP + HP * AP),
        transcendentals=2 * b_pad * HP,
        bytes_accessed=(b_pad * S * 4 + b_pad * AP * out_bytes
                        + S * HP * 2 + HP * HP * 2 + HP * AP * 4
                        + (2 * HP + AP) * 4),
    )

    mean_pad = pl.pallas_call(
        functools.partial(policy_kernel, bf16_tanh=bf16_tanh),
        out_shape=jax.ShapeDtypeStruct((b_pad, AP), out_dtype),
        grid_spec=pltpu.PrefetchScalarGridSpec(
            num_scalar_prefetch=0,
            grid=(n_steps,),
            in_specs=[
                pl.BlockSpec((tb, S), lambda i: (i, 0)),      # x tile
                pl.BlockSpec((S, HP), const),                 # w1 (bf16, padded)
                pl.BlockSpec((1, HP), const),                 # b1 (f32)
                pl.BlockSpec((HP, HP), const),                # w2 (bf16)
                pl.BlockSpec((1, HP), const),                 # b2 (f32)
                pl.BlockSpec((HP, AP), const),                # w3 (f32)
                pl.BlockSpec((1, AP), const),                 # b3 (f32)
            ],
            out_specs=pl.BlockSpec((tb, AP), lambda i: (i, 0)),  # lane-dense
        ),
        compiler_params=pltpu.CompilerParams(
            dimension_semantics=("parallel",),                # megacore on v7x
            vmem_limit_bytes=32 * 1024 * 1024),               # headroom on v5e
        cost_estimate=cost,
    )(
        x,
        params["w1p"], params["b1p"],
        params["w2p"], params["b2p"],
        params["w3p"], params["b3p"],
    )

    # sigma is x-independent: computed once in the wrapper, not per kernel call.
    sigma = jax.nn.softplus(params["sigma"])

    if return_padded:
        return mean_pad, sigma
    return mean_pad[:B, :A], sigma


def init_params(key, state_space, action_space, hidden=HIDDEN):
    """Deterministic init matching PolicyNN.init_weights():
       weights ~ Normal(0, 1), biases = 0, sigma param = 0.5."""
    assert hidden <= LANE and action_space <= LANE
    k1, k2, k3 = jax.random.split(key, 3)
    # PyTorch Linear weight is (out, in); we store the transpose (in, out).
    w1 = jax.random.normal(k1, (state_space, hidden), jnp.float32)
    w2 = jax.random.normal(k2, (hidden, hidden), jnp.float32)
    w3 = jax.random.normal(k3, (hidden, action_space), jnp.float32)
    b1 = jnp.zeros((hidden,), jnp.float32)
    b2 = jnp.zeros((hidden,), jnp.float32)
    b3 = jnp.zeros((action_space,), jnp.float32)
    sigma = jnp.full((action_space,), 0.5, jnp.float32)

    # Lane-padded (zero-filled) kernel copies.  w1/w2 in bf16 (tanh hides the
    # rounding); w3/b3 stay f32 so the final layer has no operand rounding.
    bf = jnp.bfloat16
    w1p = jnp.zeros((state_space, LANE), bf).at[:, :hidden].set(w1.astype(bf))
    w2p = jnp.zeros((LANE, LANE), bf).at[:hidden, :hidden].set(w2.astype(bf))
    w3p = jnp.zeros((LANE, LANE), jnp.float32).at[:hidden, :action_space].set(w3)
    b1p = jnp.zeros((1, LANE), jnp.float32).at[0, :hidden].set(b1)
    b2p = jnp.zeros((1, LANE), jnp.float32).at[0, :hidden].set(b2)
    b3p = jnp.zeros((1, LANE), jnp.float32).at[0, :action_space].set(b3)

    return {
        # raw (unpadded) params, kept for the pure-JAX reference
        "w1": w1, "b1": b1, "w2": w2, "b2": b2, "w3": w3, "b3": b3,
        # kernel-ready padded params
        "w1p": w1p, "b1p": b1p, "w2p": w2p, "b2p": b2p, "w3p": w3p, "b3p": b3p,
        "sigma": sigma,
    }


def reference_forward(x, params, *, bf16_tanh=False):
    """Pure-JAX reference mirroring the kernel's dtype choices."""
    bf = jnp.bfloat16
    z1 = jnp.dot(x.astype(bf), params["w1"].astype(bf),
                 preferred_element_type=jnp.float32) + params["b1"]
    h1 = jnp.tanh(z1.astype(bf)) if bf16_tanh else jnp.tanh(z1).astype(bf)
    z2 = jnp.dot(h1, params["w2"].astype(bf),
                 preferred_element_type=jnp.float32) + params["b2"]
    h2 = jnp.tanh(z2.astype(bf)) if bf16_tanh else jnp.tanh(z2)
    mean = jnp.dot(h2.astype(jnp.float32), params["w3"],
                   preferred_element_type=jnp.float32) + params["b3"]
    sigma = jax.nn.softplus(params["sigma"])
    return mean, sigma


if __name__ == "__main__":
    key = jax.random.PRNGKey(0)
    state_space, action_space = 8, 4
    bf16_tanh = default_bf16_tanh()

    pkey, xkey1, xkey2 = jax.random.split(key, 3)
    params = init_params(pkey, state_space, action_space)

    # Case 1: tiny batch (grid of 1 step).
    x_small = jax.random.normal(xkey1, (4, state_space), jnp.float32)
    mean_s, sigma_s = policy_forward(x_small, params, bf16_tanh=bf16_tanh)
    jax.block_until_ready((mean_s, sigma_s))
    ref_mean_s, ref_sigma_s = reference_forward(x_small, params, bf16_tanh=bf16_tanh)
    assert mean_s.shape == (4, action_space)
    assert sigma_s.shape == (action_space,)
    assert jnp.allclose(mean_s.astype(jnp.float32), ref_mean_s, atol=1e-1, rtol=5e-2)
    assert jnp.allclose(sigma_s, ref_sigma_s, atol=1e-6, rtol=1e-6)

    # Case 2: batch that exercises the load-balanced multi-step grid + padding
    # (B=37 -> 2 parallel steps of 24 rows, 48-row padded buffer).
    x_big = jax.random.normal(xkey2, (37, state_space), jnp.float32)
    mean_b, sigma_b = policy_forward(x_big, params, bf16_tanh=bf16_tanh)
    jax.block_until_ready((mean_b, sigma_b))
    ref_mean_b, _ = reference_forward(x_big, params, bf16_tanh=bf16_tanh)
    assert mean_b.shape == (37, action_space)
    assert jnp.allclose(mean_b.astype(jnp.float32), ref_mean_b, atol=1e-1, rtol=5e-2)

    # TODO(synk): torch.distributions.Normal object itself has no Pallas
    # equivalent; we return its (mean, sigma) parameterization instead.
    print("KERNEL_OK")
</pallas_src>

<mosaic_0001>
module attributes {stable_mosaic.version = 11 : i64} {
  func.func @policy_kernel(%arg0: i32, %arg1: memref<8x8xf32, #tpu.memory_space<vmem>>, %arg2: memref<8x128xbf16, #tpu.memory_space<vmem>>, %arg3: memref<1x128xf32, #tpu.memory_space<vmem>>, %arg4: memref<128x128xbf16, #tpu.memory_space<vmem>>, %arg5: memref<1x128xf32, #tpu.memory_space<vmem>>, %arg6: memref<128x128xf32, #tpu.memory_space<vmem>>, %arg7: memref<1x128xf32, #tpu.memory_space<vmem>>, %arg8: memref<8x128xbf16, #tpu.memory_space<vmem>>) attributes {dimension_semantics = [#tpu.dimension_semantics<parallel>], iteration_bounds = array<i64: 1>, scalar_prefetch = 0 : i64, scratch_operands = 0 : i64, tpu.core_type = #tpu.core_type<tc>, window_params = [{transform_indices = @transform_0, window_bounds = array<i64: 8, 8>}, {pipeline_mode = #tpu.pipeline_mode<synchronous>, transform_indices = @transform_1, window_bounds = array<i64: 8, 128>}, {pipeline_mode = #tpu.pipeline_mode<synchronous>, transform_indices = @transform_2, window_bounds = array<i64: 1, 128>}, {pipeline_mode = #tpu.pipeline_mode<synchronous>, transform_indices = @transform_3, window_bounds = array<i64: 128, 128>}, {pipeline_mode = #tpu.pipeline_mode<synchronous>, transform_indices = @transform_4, window_bounds = array<i64: 1, 128>}, {pipeline_mode = #tpu.pipeline_mode<synchronous>, transform_indices = @transform_5, window_bounds = array<i64: 128, 128>}, {pipeline_mode = #tpu.pipeline_mode<synchronous>, transform_indices = @transform_6, window_bounds = array<i64: 1, 128>}, {transform_indices = @transform_7, window_bounds = array<i64: 8, 128>}]} {
    %c0 = arith.constant 0 : index
    %c0_0 = arith.constant 0 : index
    %0 = vector.load %arg1[%c0, %c0_0] : memref<8x8xf32, #tpu.memory_space<vmem>>, vector<8x8xf32>
    %1 = arith.truncf %0 : vector<8x8xf32> to vector<8x8xbf16>
    %c0_1 = arith.constant 0 : index
    %c0_2 = arith.constant 0 : index
    %2 = vector.load %arg2[%c0_1, %c0_2] : memref<8x128xbf16, #tpu.memory_space<vmem>>, vector<8x128xbf16>
    %cst = arith.constant dense<0.000000e+00> : vector<8x128xf32>
    %3 = tpu.matmul %1, %2, %cst {dimension_numbers = #tpu.dot_dimension_numbers<[1], [0], [0], [1], [0, 0, 1, 1], [], []>} : vector<8x8xbf16>, vector<8x128xbf16>, vector<8x128xf32> -> vector<8x128xf32>
    %c0_3 = arith.constant 0 : index
    %c0_4 = arith.constant 0 : index
    %4 = vector.load %arg3[%c0_3, %c0_4] : memref<1x128xf32, #tpu.memory_space<vmem>>, vector<1x128xf32>
    %5 = vector.broadcast %4 : vector<1x128xf32> to vector<8x128xf32>
    %6 = arith.addf %3, %5 : vector<8x128xf32>
    %7 = arith.truncf %6 : vector<8x128xf32> to vector<8x128xbf16>
    %8 = math.tanh %7 : vector<8x128xbf16>
    %c0_5 = arith.constant 0 : index
    %c0_6 = arith.constant 0 : index
    %9 = vector.load %arg4[%c0_5, %c0_6] : memref<128x128xbf16, #tpu.memory_space<vmem>>, vector<128x128xbf16>
    %cst_7 = arith.constant dense<0.000000e+00> : vector<8x128xf32>
    %10 = tpu.matmul %8, %9, %cst_7 {dimension_numbers = #tpu.dot_dimension_numbers<[1], [0], [0], [1], [0, 0, 1, 1], [], []>} : vector<8x128xbf16>, vector<128x128xbf16>, vector<8x128xf32> -> vector<8x128xf32>
    %c0_8 = arith.constant 0 : index
    %c0_9 = arith.constant 0 : index
    %11 = vector.load %arg5[%c0_8, %c0_9] : memref<1x128xf32, #tpu.memory_space<vmem>>, vector<1x128xf32>
    %12 = vector.broadcast %11 : vector<1x128xf32> to vector<8x128xf32>
    %13 = arith.addf %10, %12 : vector<8x128xf32>
    %14 = arith.truncf %13 : vector<8x128xf32> to vector<8x128xbf16>
    %15 = math.tanh %14 : vector<8x128xbf16>
    %16 = arith.extf %15 : vector<8x128xbf16> to vector<8x128xf32>
    %c0_10 = arith.constant 0 : index
    %c0_11 = arith.constant 0 : index
    %17 = vector.load %arg6[%c0_10, %c0_11] : memref<128x128xf32, #tpu.memory_space<vmem>>, vector<128x128xf32>
    %cst_12 = arith.constant dense<0.000000e+00> : vector<8x128xf32>
    %18 = tpu.matmul %16, %17, %cst_12 {dimension_numbers = #tpu.dot_dimension_numbers<[1], [0], [0], [1], [0, 0, 1, 1], [], []>} : vector<8x128xf32>, vector<128x128xf32>, vector<8x128xf32> -> vector<8x128xf32>
    %c0_13 = arith.constant 0 : index
    %c0_14 = arith.constant 0 : index
    %19 = vector.load %arg7[%c0_13, %c0_14] : memref<1x128xf32, #tpu.memory_space<vmem>>, vector<1x128xf32>
    %20 = vector.broadcast %19 : vector<1x128xf32> to vector<8x128xf32>
    %21 = arith.addf %18, %20 : vector<8x128xf32>
    %22 = arith.truncf %21 : vector<8x128xf32> to vector<8x128xbf16>
    %c0_15 = arith.constant 0 : index
    %c0_16 = arith.constant 0 : index
    %23 = vector.load %arg8[%c0_15, %c0_16] : memref<8x128xbf16, #tpu.memory_space<vmem>>, vector<8x128xbf16>
    tpu.vector_store %arg8[%c0_15, %c0_16], %22 {strides = array<i32>} : memref<8x128xbf16, #tpu.memory_space<vmem>>, vector<8x128xbf16>,
    return
  }
  func.func @transform_0(%arg0: i32) -> (i32, i32) {
    %c0_i32 = arith.constant 0 : i32
    %c0_i32_0 = arith.constant 0 : i32
    return %arg0, %c0_i32 : i32, i32
  }
  func.func @transform_1(%arg0: i32) -> (i32, i32) {
    %c0_i32 = arith.constant 0 : i32
    %c0_i32_0 = arith.constant 0 : i32
    %c0_i32_1 = arith.constant 0 : i32
    return %c0_i32, %c0_i32_0 : i32, i32
  }
  func.func @transform_2(%arg0: i32) -> (i32, i32) {
    %c0_i32 = arith.constant 0 : i32
    %c0_i32_0 = arith.constant 0 : i32
    %c0_i32_1 = arith.constant 0 : i32
    return %c0_i32, %c0_i32_0 : i32, i32
  }
  func.func @transform_3(%arg0: i32) -> (i32, i32) {
    %c0_i32 = arith.constant 0 : i32
    %c0_i32_0 = arith.constant 0 : i32
    %c0_i32_1 = arith.constant 0 : i32
    return %c0_i32, %c0_i32_0 : i32, i32
  }
  func.func @transform_4(%arg0: i32) -> (i32, i32) {
    %c0_i32 = arith.constant 0 : i32
    %c0_i32_0 = arith.constant 0 : i32
    %c0_i32_1 = arith.constant 0 : i32
    return %c0_i32, %c0_i32_0 : i32, i32
  }
  func.func @transform_5(%arg0: i32) -> (i32, i32) {
    %c0_i32 = arith.constant 0 : i32
    %c0_i32_0 = arith.constant 0 : i32
    %c0_i32_1 = arith.constant 0 : i32
    return %c0_i32, %c0_i32_0 : i32, i32
  }
  func.func @transform_6(%arg0: i32) -> (i32, i32) {
    %c0_i32 = arith.constant 0 : i32
    %c0_i32_0 = arith.constant 0 : i32
    %c0_i32_1 = arith.constant 0 : i32
    return %c0_i32, %c0_i32_0 : i32, i32
  }
  func.func @transform_7(%arg0: i32) -> (i32, i32) {
    %c0_i32 = arith.constant 0 : i32
    %c0_i32_0 = arith.constant 0 : i32
    return %arg0, %c0_i32 : i32, i32
  }
}

</mosaic_0001>

<bundles_post_ra>
// kernel: tpu_custom_call.1
= control target key start
LH: loop header
LB: loop body
LE: loop exit
PB: predicated region body
PF: predicated region fallthrough
CT: control target
= control target key end

     0   :  { %12 = vsyncpa [#allocation3], 0  ;;  %s524_s0 = inlined_call_operand.hbm [shape: f32[8,8], index: 0, kind: input, shape index: {}]   ;;  %s525_s1 = inlined_call_operand.hbm [shape: bf16[8,128], index: 1, kind: input, shape index: {}]   ;;  %s526_s2 = inlined_call_operand.vmem [shape: f32[1,128], index: 2, kind: input, shape index: {}]   ;;  %s527_s3 = inlined_call_operand.hbm [shape: bf16[128,128], index: 3, kind: input, shape index: {}]   ;;  %s528_s4 = inlined_call_operand.vmem [shape: f32[1,128], index: 4, kind: input, shape index: {}]   ;;  %s529_s5 = inlined_call_operand.hbm [shape: f32[128,128], index: 5, kind: input, shape index: {}]   ;;  %s530_s6 = inlined_call_operand.vmem [shape: f32[1,128], index: 6, kind: input, shape index: {}]   ;;  %s531_s7 = inlined_call_operand.hbm [shape: bf16[8,128], index: 7, kind: output, shape index: {}]  }
   0x1   :  { %13 = vsyncpa [#allocation6], 0 }
   0x2   :  { %14 = vsyncpa [#allocation9], 0  ;;  %s32_s26 = sshll.u32 %s525_s1, 4  ;;  %s33_s26 = int_to_ptr.hbm [resolvable:$true] %s32_s26 }
   0x3   :  { %15 = vsyncpa [#allocation4], 0  ;;  %s451_s27 = smov [#allocation5]   ;;  %s21_s8 = sshll.u32 %s524_s0, 4  ;;  %s22_s8 = int_to_ptr.hbm [resolvable:$true] %s21_s8 }
   0x4   :  { %s34_s28 = sshll.u32 %s451_s27, 4  ;;  %s452_s9 = smov [#allocation2]   ;;  %s35_s28 = int_to_ptr.vmem [resolvable:$true] %s34_s28 }
   0x5   :  { %37 = dma.hbm_to_vmem [thread:$0]  %s33_s26, 64, %s35_s28, [#allocation6]  }
   0x6   :  { %s23_s10 = sshll.u32 %s452_s9, 4  ;;  %s44_s13 = sshll.u32 %s527_s3, 4  ;;  %s24_s10 = int_to_ptr.vmem [resolvable:$true] %s23_s10  ;;  %s45_s13 = int_to_ptr.hbm [resolvable:$true] %s44_s13 }
   0x7   :  { %26 = dma.hbm_to_vmem [thread:$0]  %s22_s8, 128, %s24_s10, [#allocation3]  }
   0x8   :  { %s453_s1 = smov [#allocation7]   ;;  %s59_s17 = sshll.u32 %s529_s5, 4  ;;  %s60_s17 = int_to_ptr.hbm [resolvable:$true] %s59_s17 }
   0x9   :  { %s46_s14 = sshll.u32 %s453_s1, 4  ;;  %s454_s18 = smov 64   ;;  %s47_s14 = int_to_ptr.vmem [resolvable:$true] %s46_s14 }
   0xa   :  { %s455_s0 = smov 4   ;;  %s456_s19 = smov [#allocation8]  }
   0xb   :  { %52 = dma.hbm_to_vmem [thread:$0]  %s45_s13, 1024, %s47_s14, [#allocation6], %s454_s18, %s454_s18, %s455_s0  }
   0xc   :  { %s61_s20 = sshll.u32 %s456_s19, 4  ;;  %s457_s21 = smov 128   ;;  %s62_s20 = int_to_ptr.vmem [resolvable:$true] %s61_s20 }
   0xd   :  { %s458_s22 = smov 8  }
   0xe   :  { %67 = dma.hbm_to_vmem [thread:$0]  %s60_s17, 2048, %s62_s20, [#allocation9], %s457_s21, %s457_s21, %s458_s22  }
   0xf   :  { %443 = dma.done.wait [#allocation3], 128  }
  0x10   :  { %444 = vsyncadd [#allocation3], 4294967168 }
  0x11   :  { %445 = dma.done.wait [#allocation6], 1088  }
  0x12   :  { %446 = vsyncadd [#allocation6], 4294966208 }
  0x13   :  { %447 = dma.done.wait [#allocation9], 2048  }
  0x14   :  { %448 = vsyncadd [#allocation9], 4294965248  ;;  %vm98_vm0 = vcmask 1043456   ;;  %v89_v0 = vld [vmem:[#allocation5] sm:$0xf]  ;;  %v87_v1 = vld [vmem:[#allocation2] sm:$0xff] }
  0x15   :  { %v306_v2 = vld [vmem:[#allocation7 + $0x38] sm:$0xff]  ;;  %v100_v3 = vsel %vm98_vm0, %v89_v0, 0  ;;  %v88_v4 = vpack.c.bf16 %v87_v1, %v87_v1  ;;  %vm94_vm1 = vcmask 64512   ;;  %v305_v5 = vld [vmem:[#allocation7 + $0x30] sm:$0xff]  ;;  %v304_v6 = vld [vmem:[#allocation7 + $0x28] sm:$0xff]  ;;  %s459_s26 = smov [#allocation10]  }
  0x16   :  { %109 = vmatpush.bf16.msra.mxu0 %v100_v3  ;;  %187 = vmatpush.bf16.msra.mxu1 %v306_v2  ;;  %v303_v7 = vld [vmem:[#allocation7 + $0x20] sm:$0xff]  ;;  %v302_v8 = vld [vmem:[#allocation7 + $0x18] sm:$0xff]  ;;  %v301_v9 = vld [vmem:[#allocation7 + $0x10] sm:$0xff]  ;;  %s252_s27 = sshll.u32 %s459_s26, 4  ;;  %s254_s30 = sshll.u32 %s531_s7, 4  ;;  %s253_s27 = int_to_ptr.vmem [resolvable:$true] %s252_s27  ;;  %s255_s30 = int_to_ptr.hbm [resolvable:$true] %s254_s30 }
  0x17   :  { %v300_v10 = vld [vmem:[#allocation7 + $0x8] sm:$0xff]  ;;  %v299_v11 = vld [vmem:[#allocation7] sm:$0xff]  ;;  %v220_v12 = vld [vmem:[#allocation8 + $0x78] sm:$0xff] }
  0x18   :  { %v219_v13 = vld [vmem:[#allocation8 + $0x70] sm:$0xff]  ;;  %225 = vmatpush.msra.mxu2 %v220_v12  ;;  %v218_v14 = vld [vmem:[#allocation8 + $0x68] sm:$0xff]  ;;  %v217_v15 = vld [vmem:[#allocation8 + $0x60] sm:$0xff] }
  0x19   :  { %266 = vmatmul.msk.bf16.vlgmr.msra.gmra.mxu0 %vm94_vm1, %v88_v4  ;;  %v216_v16 = vld [vmem:[#allocation8 + $0x58] sm:$0xff]  ;;  %v215_v17 = vld [vmem:[#allocation8 + $0x50] sm:$0xff]  ;;  %v214_v18 = vld [vmem:[#allocation8 + $0x48] sm:$0xff] }
  0x1a   :  { %188 = vmatpush.bf16.msra.mxu1 %v305_v5  ;;  %226 = vmatpush.msra.mxu2 %v219_v13  ;;  %v213_v19 = vld [vmem:[#allocation8 + $0x40] sm:$0xff]  ;;  %v316_v20 = vld [vmem:[%s526_s2] ss:$0 sm:$0xff]  ;;  %v212_v21 = vld [vmem:[#allocation8 + $0x38] sm:$0xff] }
  0x1b   :  { %v211_v29 = vld [vmem:[#allocation8 + $0x30] sm:$0xff]  ;;  %v210_v30 = vld [vmem:[#allocation8 + $0x28] sm:$0xff]  ;;  %v209_v31 = vld [vmem:[#allocation8 + $0x20] sm:$0xff] }
  0x1c   :  { %227 = vmatpush.msra.mxu2 %v218_v14  ;;  %v208_v32 = vld [vmem:[#allocation8 + $0x18] sm:$0xff]  ;;  %v207_v33 = vld [vmem:[#allocation8 + $0x10] sm:$0xff]  ;;  %v206_v34 = vld [vmem:[#allocation8 + $0x8] sm:$0xff] }
  0x1d   :  { %v205_v35 = vld [vmem:[#allocation8] sm:$0xff]  ;;  %v317_v36 = vld [vmem:[%s528_s4] ss:$0 sm:$0xff] }
  0x1e   :  { %189 = vmatpush.bf16.msra.mxu1 %v304_v6  ;;  %228 = vmatpush.msra.mxu2 %v217_v15  ;;  %v318_v43 = vld [vmem:[%s530_s6] ss:$0 sm:$0xff] }
  0x20   :  { %229 = vmatpush.msra.mxu2 %v216_v16 }
  0x22   :  { %190 = vmatpush.bf16.msra.mxu1 %v303_v7  ;;  %230 = vmatpush.msra.mxu2 %v215_v17 }
  0x24   :  { %231 = vmatpush.msra.mxu2 %v214_v18 }
  0x26   :  { %191 = vmatpush.bf16.msra.mxu1 %v302_v8  ;;  %232 = vmatpush.msra.mxu2 %v213_v19 }
  0x28   :  { %233 = vmatpush.msra.mxu2 %v212_v21 }
  0x2a   :  { %192 = vmatpush.bf16.msra.mxu1 %v301_v9  ;;  %234 = vmatpush.msra.mxu2 %v211_v29 }
  0x2c   :  { %235 = vmatpush.msra.mxu2 %v210_v30 }
  0x2e   :  { %193 = vmatpush.bf16.msra.mxu1 %v300_v10  ;;  %236 = vmatpush.msra.mxu2 %v209_v31 }
  0x30   :  { %237 = vmatpush.msra.mxu2 %v208_v32 }
  0x32   :  { %194 = vmatpush.bf16.msra.mxu1 %v299_v11  ;;  %238 = vmatpush.msra.mxu2 %v207_v33 }
  0x34   :  { %239 = vmatpush.msra.mxu2 %v206_v34 }
  0x36   :  { %240 = vmatpush.msra.mxu2 %v205_v35 }
  0x96   :  { %v111_v22 = vpop.f32.mrf.mxu0 }
  0x97   :  { %v112_v23 = vadd.f32 %v316_v20, %v111_v22 }
  0x99   :  { %v115_v24 = vpack.c.bf16 %v112_v23, %v112_v23 }
  0x9b   :  { %v116_v25 = vunpack.c.l.bf16 %v115_v24 }
  0x9d   :  { %319 = vtanh.f32 %v116_v25 }
  0x9e   :  { %v113_v26 = vpop.f32.mrf.mxu0 }
  0xa3   :  { %v320_v27 = vpop.eup %319 }
  0xa4   :  { %v118_v28 = vpack.c.bf16 %v320_v27, %v320_v27 }
  0xa6   :  { %195 = vmatmul.bf16.vlgmr.msra.gmra.mxu1 %v118_v28 }
 0x123   :  { %v196_v37 = vpop.f32.mrf.mxu1 }
 0x124   :  { %v197_v38 = vadd.f32 %v317_v36, %v196_v37 }
 0x126   :  { %v200_v39 = vpack.c.bf16 %v197_v38, %v197_v38 }
 0x128   :  { %v201_v40 = vunpack.c.l.bf16 %v200_v39 }
 0x12a   :  { %321 = vtanh.f32 %v201_v40 }
 0x12b   :  { %v198_v41 = vpop.f32.mrf.mxu1 }
 0x130   :  { %v322_v42 = vpop.eup %321 }
 0x131   :  { %241 = vmatmul.f32.vlgmr.msra.gmra.mxu2 %v322_v42 }
 0x1b4   :  { %v242_v44 = vpop.f32.mrf.mxu2 }
 0x1b5   :  { %v243_v45 = vadd.f32 %v318_v43, %v242_v44 }
 0x1b7   :  { %v245_v46 = vpack.c.bf16 %v243_v45, %v243_v45 }
 0x1b9   :  { %246 = vst [vmem:[#allocation10] sm:$0xf] %v245_v46 }
 0x1ba   :  { %257 = dma.vmem_to_hbm [thread:$0]  %s253_s27, 64, %s255_s30, [#allocation4]  }
 0x1bb   :  { %449 = dma.done.wait [#allocation4], 64  }
 0x1bc   :  { %450 = vsyncadd [#allocation4], 4294967232 }
 0x1bd   :  { %262 = vsyncpa [#allocation3], 1 }
 0x1be   :  { %263 = vsyncpa [#allocation6], 1 }
 0x1bf   :  { %264 = vsyncpa [#allocation9], 1 }
 0x1c0   :  { %265 = vsyncpa [#allocation4], 1 }

</bundles_post_ra>
